<compile_context>
chip_gen: v7x
topology: tpu7x:2x2x1
jax: 0.10.0
libtpu: 0.0.40
codegen_flags: <defaults>
</compile_context>

<pallas_src>
import functools

import jax
import jax.numpy as jnp
from jax.experimental import pallas as pl
from jax.experimental.pallas import tpu as pltpu


def _round_up(x: int, m: int) -> int:
    return ((x + m - 1) // m) * m


def mlp_kernel(x_ref, w1_ref, b1_ref, w2_ref, b2_ref, o_ref):
    # hidden = sigmoid(X @ W1 + b1); bf16 operands, f32 accumulation.
    h = jnp.dot(x_ref[...], w1_ref[...], preferred_element_type=jnp.float32)
    h = h + b1_ref[...]                                    # b1 (1, Hp) broadcasts over batch
    h = pl.reciprocal(1.0 + jnp.exp(-h), approx=True)      # sigmoid: exp on EUP, recip on EUP
    # out = hidden @ W2 + b2 (second matmul also bf16 x bf16 -> f32 acc).
    o = jnp.dot(h.astype(w2_ref.dtype), w2_ref[...], preferred_element_type=jnp.float32)
    o_ref[...] = (o + b2_ref[...]).astype(o_ref.dtype)


def mlp_forward(x, w1, b1, w2, b2, *, bm=256, compute_dtype=jnp.bfloat16):
    """X:[B,1024] f32, W1:[1024,64], b1:[1,64], W2:[64,36], b2:[1,36] -> [B,36] f32."""
    B, D_in = x.shape
    H = w1.shape[1]
    D_out = w2.shape[1]
    assert w1.shape[0] == D_in and w2.shape[0] == H
    assert D_in % 128 == 0, "input feature dim must be lane-aligned"
    assert bm % 8 == 0

    # Lane-pad hidden and output dims to multiples of 128.
    # Hidden padding is exact: padded W1 cols / b1 cols are 0 -> sigmoid(0)=0.5, but the
    # corresponding padded W2 rows are 0, so they contribute nothing to the output.
    H_pad = _round_up(H, 128)
    Dout_pad = _round_up(D_out, 128)

    # Batch tile: big enough to feed the MXU, but don't over-pad tiny batches.
    bm_eff = min(bm, _round_up(B, 8))
    B_pad = _round_up(B, bm_eff)

    x_p = jnp.pad(x, ((0, B_pad - B), (0, 0))).astype(compute_dtype)
    w1_p = jnp.pad(w1, ((0, 0), (0, H_pad - H))).astype(compute_dtype)
    b1_p = jnp.pad(b1, ((0, 0), (0, H_pad - H))).astype(jnp.float32)
    w2_p = jnp.pad(w2, ((0, H_pad - H), (0, Dout_pad - D_out))).astype(compute_dtype)
    b2_p = jnp.pad(b2, ((0, 0), (0, Dout_pad - D_out))).astype(jnp.float32)

    grid = (B_pad // bm_eff,)

    itemsize = jnp.dtype(compute_dtype).itemsize
    cost = pl.CostEstimate(
        flops=2 * B_pad * (D_in * H_pad + H_pad * Dout_pad),
        transcendentals=B_pad * H_pad,
        bytes_accessed=(B_pad * D_in * itemsize          # X
                        + D_in * H_pad * itemsize        # W1
                        + H_pad * Dout_pad * itemsize    # W2
                        + (H_pad + Dout_pad) * 4         # biases
                        + B_pad * Dout_pad * 4),         # output (f32)
    )

    out_p = pl.pallas_call(
        mlp_kernel,
        out_shape=jax.ShapeDtypeStruct((B_pad, Dout_pad), jnp.float32),
        grid_spec=pltpu.PrefetchScalarGridSpec(
            num_scalar_prefetch=0,
            grid=grid,
            in_specs=[
                pl.BlockSpec((bm_eff, D_in), lambda i: (i, 0)),    # X tile over batch
                pl.BlockSpec((D_in, H_pad), lambda i: (0, 0)),     # W1 (resident)
                pl.BlockSpec((1, H_pad), lambda i: (0, 0)),        # b1 (resident)
                pl.BlockSpec((H_pad, Dout_pad), lambda i: (0, 0)), # W2 (resident)
                pl.BlockSpec((1, Dout_pad), lambda i: (0, 0)),     # b2 (resident)
            ],
            out_specs=pl.BlockSpec((bm_eff, Dout_pad), lambda i: (i, 0)),
        ),
        compiler_params=pltpu.CompilerParams(
            dimension_semantics=("parallel",),
        ),
        cost_estimate=cost,
    )(x_p, w1_p, b1_p, w2_p, b2_p)

    return out_p[:B, :D_out]


def init_params(key):
    # Deterministic init mimicking nn.Linear's U(-1/sqrt(fan_in), 1/sqrt(fan_in)).
    k1, k2, k3, k4 = jax.random.split(key, 4)
    bound1 = 1.0 / jnp.sqrt(1024.0)
    bound2 = 1.0 / jnp.sqrt(64.0)
    w1 = jax.random.uniform(k1, (1024, 64), jnp.float32, -bound1, bound1)
    b1 = jax.random.uniform(k2, (1, 64), jnp.float32, -bound1, bound1)
    w2 = jax.random.uniform(k3, (64, 36), jnp.float32, -bound2, bound2)
    b2 = jax.random.uniform(k4, (1, 36), jnp.float32, -bound2, bound2)
    return w1, b1, w2, b2


if __name__ == "__main__":
    key = jax.random.PRNGKey(0)
    kx, kp = jax.random.split(key)
    B = 8  # small test batch; kernel tiles up to bm=256 for large batches
    x = jax.random.normal(kx, (B, 1024), jnp.float32)
    w1, b1, w2, b2 = init_params(kp)

    out = mlp_forward(x, w1, b1, w2, b2)
    out = jax.block_until_ready(out)

    # Reference check in plain JAX f32 (same math as the PyTorch module).
    h_ref = jax.nn.sigmoid(x @ w1 + b1)
    ref = h_ref @ w2 + b2
    assert out.shape == (B, 36)
    # bf16 streaming operands + approx reciprocal => loosened tolerance vs f32 reference.
    assert jnp.allclose(out, ref, atol=2e-2, rtol=2e-2), (
        f"max abs err {jnp.max(jnp.abs(out - ref))}")

    print("KERNEL_OK")
</pallas_src>

<mosaic_0001>
module attributes {stable_mosaic.version = 11 : i64} {
  func.func @mlp_kernel(%arg0: i32, %arg1: memref<8x1024xbf16, #tpu.memory_space<vmem>>, %arg2: memref<1024x128xbf16, #tpu.memory_space<vmem>>, %arg3: memref<1x128xf32, #tpu.memory_space<vmem>>, %arg4: memref<128x128xbf16, #tpu.memory_space<vmem>>, %arg5: memref<1x128xf32, #tpu.memory_space<vmem>>, %arg6: memref<8x128xf32, #tpu.memory_space<vmem>>) attributes {dimension_semantics = [#tpu.dimension_semantics<parallel>], iteration_bounds = array<i64: 1>, scalar_prefetch = 0 : i64, scratch_operands = 0 : i64, tpu.core_type = #tpu.core_type<tc>, window_params = [{transform_indices = @transform_0, window_bounds = array<i64: 8, 1024>}, {pipeline_mode = #tpu.pipeline_mode<synchronous>, transform_indices = @transform_1, window_bounds = array<i64: 1024, 128>}, {pipeline_mode = #tpu.pipeline_mode<synchronous>, transform_indices = @transform_2, window_bounds = array<i64: 1, 128>}, {pipeline_mode = #tpu.pipeline_mode<synchronous>, transform_indices = @transform_3, window_bounds = array<i64: 128, 128>}, {pipeline_mode = #tpu.pipeline_mode<synchronous>, transform_indices = @transform_4, window_bounds = array<i64: 1, 128>}, {transform_indices = @transform_5, window_bounds = array<i64: 8, 128>}]} {
    %c0 = arith.constant 0 : index
    %c0_0 = arith.constant 0 : index
    %0 = vector.load %arg1[%c0, %c0_0] : memref<8x1024xbf16, #tpu.memory_space<vmem>>, vector<8x1024xbf16>
    %c0_1 = arith.constant 0 : index
    %c0_2 = arith.constant 0 : index
    %1 = vector.load %arg2[%c0_1, %c0_2] : memref<1024x128xbf16, #tpu.memory_space<vmem>>, vector<1024x128xbf16>
    %cst = arith.constant dense<0.000000e+00> : vector<8x128xf32>
    %2 = tpu.matmul %0, %1, %cst {dimension_numbers = #tpu.dot_dimension_numbers<[1], [0], [0], [1], [0, 0, 1, 1], [], []>} : vector<8x1024xbf16>, vector<1024x128xbf16>, vector<8x128xf32> -> vector<8x128xf32>
    %c0_3 = arith.constant 0 : index
    %c0_4 = arith.constant 0 : index
    %3 = vector.load %arg3[%c0_3, %c0_4] : memref<1x128xf32, #tpu.memory_space<vmem>>, vector<1x128xf32>
    %4 = vector.broadcast %3 : vector<1x128xf32> to vector<8x128xf32>
    %5 = arith.addf %2, %4 : vector<8x128xf32>
    %cst_5 = arith.constant 0.000000e+00 : f32
    %6 = vector.broadcast %cst_5 : f32 to vector<8x128xf32>
    %7 = arith.subf %6, %5 : vector<8x128xf32>
    %8 = math.exp %7 : vector<8x128xf32>
    %cst_6 = arith.constant 1.000000e+00 : f32
    %9 = vector.broadcast %cst_6 : f32 to vector<8x128xf32>
    %10 = arith.addf %9, %8 : vector<8x128xf32>
    %11 = tpu.reciprocal %10 {approx = true} : vector<8x128xf32> -> vector<8x128xf32>
    %12 = arith.truncf %11 : vector<8x128xf32> to vector<8x128xbf16>
    %c0_7 = arith.constant 0 : index
    %c0_8 = arith.constant 0 : index
    %13 = vector.load %arg4[%c0_7, %c0_8] : memref<128x128xbf16, #tpu.memory_space<vmem>>, vector<128x128xbf16>
    %cst_9 = arith.constant dense<0.000000e+00> : vector<8x128xf32>
    %14 = tpu.matmul %12, %13, %cst_9 {dimension_numbers = #tpu.dot_dimension_numbers<[1], [0], [0], [1], [0, 0, 1, 1], [], []>} : vector<8x128xbf16>, vector<128x128xbf16>, vector<8x128xf32> -> vector<8x128xf32>
    %c0_10 = arith.constant 0 : index
    %c0_11 = arith.constant 0 : index
    %15 = vector.load %arg5[%c0_10, %c0_11] : memref<1x128xf32, #tpu.memory_space<vmem>>, vector<1x128xf32>
    %16 = vector.broadcast %15 : vector<1x128xf32> to vector<8x128xf32>
    %17 = arith.addf %14, %16 : vector<8x128xf32>
    %c0_12 = arith.constant 0 : index
    %c0_13 = arith.constant 0 : index
    %18 = vector.load %arg6[%c0_12, %c0_13] : memref<8x128xf32, #tpu.memory_space<vmem>>, vector<8x128xf32>
    tpu.vector_store %arg6[%c0_12, %c0_13], %17 {strides = array<i32>} : memref<8x128xf32, #tpu.memory_space<vmem>>, vector<8x128xf32>,
    return
  }
  func.func @transform_0(%arg0: i32) -> (i32, i32) {
    %c0_i32 = arith.constant 0 : i32
    %c0_i32_0 = arith.constant 0 : i32
    return %arg0, %c0_i32 : i32, i32
  }
  func.func @transform_1(%arg0: i32) -> (i32, i32) {
    %c0_i32 = arith.constant 0 : i32
    %c0_i32_0 = arith.constant 0 : i32
    %c0_i32_1 = arith.constant 0 : i32
    return %c0_i32, %c0_i32_0 : i32, i32
  }
  func.func @transform_2(%arg0: i32) -> (i32, i32) {
    %c0_i32 = arith.constant 0 : i32
    %c0_i32_0 = arith.constant 0 : i32
    %c0_i32_1 = arith.constant 0 : i32
    return %c0_i32, %c0_i32_0 : i32, i32
  }
  func.func @transform_3(%arg0: i32) -> (i32, i32) {
    %c0_i32 = arith.constant 0 : i32
    %c0_i32_0 = arith.constant 0 : i32
    %c0_i32_1 = arith.constant 0 : i32
    return %c0_i32, %c0_i32_0 : i32, i32
  }
  func.func @transform_4(%arg0: i32) -> (i32, i32) {
    %c0_i32 = arith.constant 0 : i32
    %c0_i32_0 = arith.constant 0 : i32
    %c0_i32_1 = arith.constant 0 : i32
    return %c0_i32, %c0_i32_0 : i32, i32
  }
  func.func @transform_5(%arg0: i32) -> (i32, i32) {
    %c0_i32 = arith.constant 0 : i32
    %c0_i32_0 = arith.constant 0 : i32
    return %arg0, %c0_i32 : i32, i32
  }
}

</mosaic_0001>

<bundles_post_ra>
// kernel: tpu_custom_call.1
= control target key start
LH: loop header
LB: loop body
LE: loop exit
PB: predicated region body
PF: predicated region fallthrough
CT: control target
= control target key end

     0   :  { %10 = vsyncpa [#allocation3], 0  ;;  %s1389_s0 = inlined_call_operand.hbm [shape: bf16[8,1024], index: 0, kind: input, shape index: {}]   ;;  %s1390_s1 = inlined_call_operand.hbm [shape: bf16[1024,128], index: 1, kind: input, shape index: {}]   ;;  %s1391_s2 = inlined_call_operand.vmem [shape: f32[1,128], index: 2, kind: input, shape index: {}]   ;;  %s1392_s3 = inlined_call_operand.hbm [shape: bf16[128,128], index: 3, kind: input, shape index: {}]   ;;  %s1393_s4 = inlined_call_operand.vmem [shape: f32[1,128], index: 4, kind: input, shape index: {}]   ;;  %s1394_s5 = inlined_call_operand.hbm [shape: f32[8,128], index: 5, kind: output, shape index: {}]  }
   0x1   :  { %11 = vsyncpa [#allocation6], 0 }
   0x2   :  { %12 = vsyncpa [#allocation4], 0  ;;  %s1291_s18 = smov [#allocation5]   ;;  %s1197_s22 = scalar_lea.hbm %s1390_s1, 8192 }
   0x3   :  { %s28_s19 = sshll.u32 %s1291_s18, 4  ;;  %p1198_p0 = scmp.ne.s32.totalorder %s1390_s1, %s1197_s22  ;;  %s29_s19 = int_to_ptr.vmem [resolvable:$true] %s28_s19 }
   0x4   :  { %p1201_p1 = scmp.lt.u32.totalorder %s1197_s22, %s1390_s1 }
   0x6   :  { %p1203_p2 = pnand %p1201_p1, %p1198_p0 }
   0x8   :  { %1206 = shalt.err (!%p1203_p2)
}
   0x9   :  { %s1207_s27 = scalar_lea.vmem %s29_s19, 8192  ;;  %p1212_p4 = scmp.lt.s32.totalorder %s29_s19, %s29_s19 }
   0xa   :  { %p1208_p3 = scmp.ne.s32.totalorder %s29_s19, %s1207_s27  ;;  %p1213_p5 = scmp.lt.s32.totalorder %s1207_s27, %s1207_s27 }
   0xc   :  { %p1214_p6 = por %p1213_p5, %p1212_p4 }
   0xe   :  { %p1215_p7 = pnand %p1214_p6, %p1208_p3 }
  0x10   :  { %1218 = shalt.err (!%p1215_p7)
}
  0x11   :  { %s1292_s28 = smov 64   ;;  %s1293_s29 = smov 4  }
  0x12   :  { %34 = dma.hbm_to_vmem [thread:$0]  %s1390_s1, 8192, %s29_s19, [#allocation6], %s1292_s28, %s1292_s28, %s1293_s29  }
  0x13   :  { %s1294_s7 = smov [#allocation2]   ;;  %s1295_s9 = smov [#allocation7]  }
  0x14   :  { %s19_s8 = sshll.u32 %s1294_s7, 4  ;;  %s42_s10 = sshll.u32 %s1295_s9, 4  ;;  %s20_s8 = int_to_ptr.vmem [resolvable:$true] %s19_s8  ;;  %s43_s10 = int_to_ptr.vmem [resolvable:$true] %s42_s10 }
  0x15   :  { %s1219_s13 = scalar_lea.hbm %s1389_s0, 512 }
  0x16   :  { %p1220_p8 = scmp.ne.s32.totalorder %s1389_s0, %s1219_s13  ;;  %p1223_p9 = scmp.lt.u32.totalorder %s1219_s13, %s1389_s0 }
  0x18   :  { %p1225_p10 = pnand %p1223_p9, %p1220_p8 }
  0x1a   :  { %1228 = shalt.err (!%p1225_p10)
}
  0x1b   :  { %s1229_s1 = scalar_lea.vmem %s20_s8, 512  ;;  %p1234_p12 = scmp.lt.s32.totalorder %s20_s8, %s20_s8 }
  0x1c   :  { %p1230_p11 = scmp.ne.s32.totalorder %s20_s8, %s1229_s1  ;;  %p1235_p13 = scmp.lt.s32.totalorder %s1229_s1, %s1229_s1 }
  0x1e   :  { %p1236_p0 = por %p1235_p13, %p1234_p12 }
  0x20   :  { %p1237_p1 = pnand %p1236_p0, %p1230_p11 }
  0x22   :  { %1240 = shalt.err (!%p1237_p1)
}
  0x23   :  { %22 = dma.hbm_to_vmem [thread:$0]  %s1389_s0, 512, %s20_s8, [#allocation3]  }
  0x24   :  { %s1241_s22 = scalar_lea.hbm %s1392_s3, 1024 }
  0x25   :  { %p1242_p2 = scmp.ne.s32.totalorder %s1392_s3, %s1241_s22  ;;  %p1245_p3 = scmp.lt.u32.totalorder %s1241_s22, %s1392_s3 }
  0x27   :  { %p1247_p4 = pnand %p1245_p3, %p1242_p2 }
  0x29   :  { %1250 = shalt.err (!%p1247_p4)
}
  0x2a   :  { %s1251_s27 = scalar_lea.vmem %s43_s10, 1024  ;;  %p1256_p6 = scmp.lt.s32.totalorder %s43_s10, %s43_s10 }
  0x2b   :  { %p1252_p5 = scmp.ne.s32.totalorder %s43_s10, %s1251_s27  ;;  %p1257_p7 = scmp.lt.s32.totalorder %s1251_s27, %s1251_s27 }
  0x2d   :  { %p1258_p8 = por %p1257_p7, %p1256_p6 }
  0x2f   :  { %p1259_p9 = pnand %p1258_p8, %p1252_p5 }
  0x31   :  { %1262 = shalt.err (!%p1259_p9)
}
  0x32   :  { %48 = dma.hbm_to_vmem [thread:$0]  %s1392_s3, 1024, %s43_s10, [#allocation6], %s1292_s28, %s1292_s28, %s1293_s29  }
  0x33   :  { %1285 = dma.done.wait [#allocation3], 512  }
  0x34   :  { %1286 = vsyncadd [#allocation3], 4294966784 }
  0x35   :  { %1287 = dma.done.wait [#allocation6], 9216  }
  0x36   :  { %1288 = vsyncadd [#allocation6], 4294958080  ;;  %v1113_v0 = vld [vmem:[#allocation5 + $0x40] sm:$0xff]   ;;  %v1117_v4 = vld [vmem:[#allocation5 + $0x48] sm:$0xff]   ;;  %vm1297_vm0 = vmmov 0   ;;  %s1298_s6 = smov [#allocation8]  }
  0x37   :  { %v1114_v1 = vld [vmem:[#allocation5 + $0xc0] sm:$0xff]   ;;  %988 = vmatprep.subr.bf16.mxu0 %v1113_v0  ;;  %v1118_v5 = vld [vmem:[#allocation5 + $0xc8] sm:$0xff]   ;;  %v1121_v8 = vld [vmem:[#allocation5 + $0x50] sm:$0xff]   ;;  %s896_s7 = sshll.u32 %s1298_s6, 4  ;;  %s897_s7 = int_to_ptr.vmem [resolvable:$true] %s896_s7 }
  0x38   :  { %v1115_v2 = vld [vmem:[#allocation5] sm:$0xff]   ;;  %1010 = vmatprep.subr.bf16.mxu1 %v1114_v1  ;;  %v1119_v6 = vld [vmem:[#allocation5 + $0x8] sm:$0xff]   ;;  %v1122_v9 = vld [vmem:[#allocation5 + $0xd0] sm:$0xff]   ;;  %s1263_s8 = scalar_lea.vmem %s897_s7, 128  ;;  %p1268_p11 = scmp.lt.s32.totalorder %s897_s7, %s897_s7 }
  0x39   :  { %v1116_v3 = vld [vmem:[#allocation5 + $0x80] sm:$0xff]   ;;  %989 = vmatpush3.bf16.msra.mxu0 %v1115_v2  ;;  %v1120_v7 = vld [vmem:[#allocation5 + $0x88] sm:$0xff]   ;;  %v1123_v10 = vld [vmem:[#allocation5 + $0x10] sm:$0xff]   ;;  %p1264_p10 = scmp.ne.s32.totalorder %s897_s7, %s1263_s8  ;;  %p1269_p12 = scmp.lt.s32.totalorder %s1263_s8, %s1263_s8 }
  0x3a   :  { %1011 = vmatpush3.bf16.msra.mxu1 %v1116_v3  ;;  %990 = vmatprep.subr.bf16.mxu0 %v1117_v4  ;;  %v1124_v11 = vld [vmem:[#allocation5 + $0x90] sm:$0xff]   ;;  %v1125_v12 = vld [vmem:[#allocation5 + $0x58] sm:$0xff]   ;;  %v1129_v16 = vld [vmem:[#allocation5 + $0x60] sm:$0xff]  }
  0x3b   :  { %1012 = vmatprep.subr.bf16.mxu1 %v1118_v5  ;;  %v1126_v13 = vld [vmem:[#allocation5 + $0xd8] sm:$0xff]   ;;  %v1130_v17 = vld [vmem:[#allocation5 + $0xe0] sm:$0xff]   ;;  %v1133_v20 = vld [vmem:[#allocation5 + $0x68] sm:$0xff]   ;;  %p1270_p13 = por %p1269_p12, %p1268_p11 }
  0x3c   :  { %v1127_v14 = vld [vmem:[#allocation5 + $0x18] sm:$0xff]   ;;  %v1131_v18 = vld [vmem:[#allocation5 + $0x20] sm:$0xff]   ;;  %v1134_v21 = vld [vmem:[#allocation5 + $0xe8] sm:$0xff]  }
  0x3d   :  { %991 = vmatpush3.bf16.msra.mxu0 %v1119_v6  ;;  %v1128_v15 = vld [vmem:[#allocation5 + $0x98] sm:$0xff]   ;;  %v1132_v19 = vld [vmem:[#allocation5 + $0xa0] sm:$0xff]   ;;  %v1135_v22 = vld [vmem:[#allocation5 + $0x28] sm:$0xff]   ;;  %p1271_p0 = pnand %p1270_p13, %p1264_p10 }
  0x3e   :  { %1013 = vmatpush3.bf16.msra.mxu1 %v1120_v7  ;;  %992 = vmatprep.subr.bf16.mxu0 %v1121_v8  ;;  %v1136_v23 = vld [vmem:[#allocation5 + $0xa8] sm:$0xff]   ;;  %v1137_v24 = vld [vmem:[#allocation5 + $0x70] sm:$0xff]   ;;  %v1141_v28 = vld [vmem:[#allocation5 + $0x78] sm:$0xff]  }
  0x3f   :  { %1014 = vmatprep.subr.bf16.mxu1 %v1122_v9  ;;  %v1138_v25 = vld [vmem:[#allocation5 + $0xf0] sm:$0xff]   ;;  %v1142_v29 = vld [vmem:[#allocation5 + $0xf8] sm:$0xff]   ;;  %v61_v32 = vld [vmem:[#allocation2] sm:$0xff] }
  0x40   :  { %v1139_v26 = vld [vmem:[#allocation5 + $0x30] sm:$0xff]   ;;  %v1143_v30 = vld [vmem:[#allocation5 + $0x38] sm:$0xff]   ;;  %v62_v33 = vld [vmem:[#allocation2 + $0x8] sm:$0xff]  ;;  %v907_v34 = vcombine.low %v61_v32, %v61_v32  ;;  %v908_v35 = vcombine.high %v61_v32, %v61_v32 }
  0x41   :  { %993 = vmatpush3.bf16.msra.mxu0 %v1123_v10  ;;  %v1140_v27 = vld [vmem:[#allocation5 + $0xb0] sm:$0xff]   ;;  %v1144_v31 = vld [vmem:[#allocation5 + $0xb8] sm:$0xff]   ;;  %v909_v36 = vcombine.low %v62_v33, %v62_v33  ;;  %v910_v37 = vcombine.high %v62_v33, %v62_v33  ;;  %v1149_v38 = vld [vmem:[#allocation5 + $0x140] sm:$0xff]  }
  0x42   :  { %1015 = vmatpush3.bf16.msra.mxu1 %v1124_v11  ;;  %994 = vmatprep.subr.bf16.mxu0 %v1125_v12  ;;  %v1150_v39 = vld [vmem:[#allocation5 + $0x1c0] sm:$0xff]   ;;  %v1153_v42 = vld [vmem:[#allocation5 + $0x148] sm:$0xff]   ;;  %v1157_v46 = vld [vmem:[#allocation5 + $0x150] sm:$0xff]  }
  0x43   :  { %1016 = vmatprep.subr.bf16.mxu1 %v1126_v13  ;;  %644 = vmatprep.mubr.bf16.mxu0 %v908_v35  ;;  %v1151_v40 = vld [vmem:[#allocation5 + $0x100] sm:$0xff]   ;;  %v1154_v43 = vld [vmem:[#allocation5 + $0x1c8] sm:$0xff]   ;;  %v1158_v47 = vld [vmem:[#allocation5 + $0x1d0] sm:$0xff]   ;;  %v1296_v13 = vmov 0.0  }
  0x44   :  { %684 = vmatprep.mubr.bf16.mxu1 %v910_v37  ;;  %v1152_v41 = vld [vmem:[#allocation5 + $0x180] sm:$0xff]   ;;  %v1155_v44 = vld [vmem:[#allocation5 + $0x108] sm:$0xff]   ;;  %v1159_v48 = vld [vmem:[#allocation5 + $0x110] sm:$0xff]  }
  0x45   :  { %995 = vmatpush3.bf16.msra.mxu0 %v1127_v14  ;;  %v1156_v45 = vld [vmem:[#allocation5 + $0x188] sm:$0xff]   ;;  %v1160_v49 = vld [vmem:[#allocation5 + $0x190] sm:$0xff]   ;;  %v1161_v50 = vld [vmem:[#allocation5 + $0x158] sm:$0xff]  }
  0x46   :  { %1017 = vmatpush3.bf16.msra.mxu1 %v1128_v15  ;;  %996 = vmatprep.subr.bf16.mxu0 %v1129_v16  ;;  %v1162_v51 = vld [vmem:[#allocation5 + $0x1d8] sm:$0xff]   ;;  %v1165_v54 = vld [vmem:[#allocation5 + $0x160] sm:$0xff]   ;;  %v1169_v58 = vld [vmem:[#allocation5 + $0x168] sm:$0xff]  }
  0x47   :  { %1018 = vmatprep.subr.bf16.mxu1 %v1130_v17  ;;  %v1163_v52 = vld [vmem:[#allocation5 + $0x118] sm:$0xff]   ;;  %v1166_v55 = vld [vmem:[#allocation5 + $0x1e0] sm:$0xff]   ;;  %v1170_v59 = vld [vmem:[#allocation5 + $0x1e8] sm:$0xff]  }
  0x48   :  { %v1164_v53 = vld [vmem:[#allocation5 + $0x198] sm:$0xff]   ;;  %v1167_v56 = vld [vmem:[#allocation5 + $0x120] sm:$0xff]   ;;  %v1171_v60 = vld [vmem:[#allocation5 + $0x128] sm:$0xff]  }
  0x49   :  { %997 = vmatpush3.bf16.msra.mxu0 %v1131_v18  ;;  %v1168_v57 = vld [vmem:[#allocation5 + $0x1a0] sm:$0xff]   ;;  %v1172_v61 = vld [vmem:[#allocation5 + $0x1a8] sm:$0xff]   ;;  %v1173_v62 = vld [vmem:[#allocation5 + $0x170] sm:$0xff]  }
  0x4a   :  { %1019 = vmatpush3.bf16.msra.mxu1 %v1132_v19  ;;  %998 = vmatprep.subr.bf16.mxu0 %v1133_v20  ;;  %v1174_v63 = vld [vmem:[#allocation5 + $0x1f0] sm:$0xff]   ;;  %v1177_v2 = vld [vmem:[#allocation5 + $0x178] sm:$0xff]   ;;  %v1185_v12 = vld [vmem:[#allocation7] sm:$0xff]  }
  0x4b   :  { %1020 = vmatprep.subr.bf16.mxu1 %v1134_v21  ;;  %v1175_v0 = vld [vmem:[#allocation5 + $0x130] sm:$0xff]   ;;  %v1178_v3 = vld [vmem:[#allocation5 + $0x1f8] sm:$0xff]   ;;  %v1186_v14 = vld [vmem:[#allocation7 + $0x8] sm:$0xff]  }
  0x4c   :  { %v1176_v1 = vld [vmem:[#allocation5 + $0x1b0] sm:$0xff]   ;;  %v1179_v4 = vld [vmem:[#allocation5 + $0x138] sm:$0xff]   ;;  %v1189_v17 = vld [vmem:[#allocation7 + $0x20] sm:$0xff]  }
  0x4d   :  { %999 = vmatpush3.bf16.msra.mxu0 %v1135_v22  ;;  %v1180_v5 = vld [vmem:[#allocation5 + $0x1b8] sm:$0xff]   ;;  %v63_v6 = vld [vmem:[#allocation2 + $0x10] sm:$0xff]  ;;  %v1190_v18 = vld [vmem:[#allocation7 + $0x28] sm:$0xff]  }
  0x4e   :  { %1021 = vmatpush3.bf16.msra.mxu1 %v1136_v23  ;;  %1000 = vmatprep.subr.bf16.mxu0 %v1137_v24  ;;  %v911_v7 = vcombine.low %v63_v6, %v63_v6  ;;  %v912_v8 = vcombine.high %v63_v6, %v63_v6  ;;  %v64_v9 = vld [vmem:[#allocation2 + $0x18] sm:$0xff]  ;;  %v1187_v15 = vld [vmem:[#allocation7 + $0x10] sm:$0xff]   ;;  %v906_v23 = vld [vmem:[%s1391_s2] ss:$0 sm:$0xff] }
  0x4f   :  { %1022 = vmatprep.subr.bf16.mxu1 %v1138_v25  ;;  %v913_v10 = vcombine.low %v64_v9, %v64_v9  ;;  %v914_v11 = vcombine.high %v64_v9, %v64_v9  ;;  %v1188_v16 = vld [vmem:[#allocation7 + $0x18] sm:$0xff]   ;;  %v1191_v19 = vld [vmem:[#allocation7 + $0x30] sm:$0xff]  }
  0x50   :  { %v1192_v20 = vld [vmem:[#allocation7 + $0x38] sm:$0xff]  }
  0x51   :  { %1001 = vmatpush3.bf16.msra.mxu0 %v1139_v26 }
  0x52   :  { %1023 = vmatpush3.bf16.msra.mxu1 %v1140_v27  ;;  %1002 = vmatprep.subr.bf16.mxu0 %v1141_v28 }
  0x53   :  { %1024 = vmatprep.subr.bf16.mxu1 %v1142_v29 }
  0x55   :  { %1003 = vmatpush3.bf16.msra.mxu0 %v1143_v30 }
  0x56   :  { %1025 = vmatpush3.bf16.msra.mxu1 %v1144_v31  ;;  %1032 = vmatprep.subr.bf16.mxu0 %v1149_v38 }
  0x57   :  { %1054 = vmatprep.subr.bf16.mxu1 %v1150_v39 }
  0x58   :  { %645 = vmatmul.mubr.bf16.vlgmr.msra.gmra.mrb[0].mxu0 %v907_v34 }
  0x59   :  { %685 = vmatmul.mubr.bf16.vlgmr.msra.gmra.mrb[0].mxu1 %v909_v36  ;;  %1033 = vmatpush3.bf16.msra.mxu0 %v1151_v40 }
  0x5a   :  { %1055 = vmatpush3.bf16.msra.mxu1 %v1152_v41  ;;  %1034 = vmatprep.subr.bf16.mxu0 %v1153_v42 }
  0x5b   :  { %1056 = vmatprep.subr.bf16.mxu1 %v1154_v43  ;;  %724 = vmatprep.mubr.bf16.mxu0 %v912_v8 }
  0x5c   :  { %764 = vmatprep.mubr.bf16.mxu1 %v914_v11 }
  0x5d   :  { %1035 = vmatpush3.bf16.msra.mxu0 %v1155_v44 }
  0x5e   :  { %1057 = vmatpush3.bf16.msra.mxu1 %v1156_v45  ;;  %1036 = vmatprep.subr.bf16.mxu0 %v1157_v46 }
  0x5f   :  { %1058 = vmatprep.subr.bf16.mxu1 %v1158_v47 }
  0x61   :  { %1037 = vmatpush3.bf16.msra.mxu0 %v1159_v48 }
  0x62   :  { %1059 = vmatpush3.bf16.msra.mxu1 %v1160_v49  ;;  %1038 = vmatprep.subr.bf16.mxu0 %v1161_v50 }
  0x63   :  { %1060 = vmatprep.subr.bf16.mxu1 %v1162_v51 }
  0x65   :  { %1039 = vmatpush3.bf16.msra.mxu0 %v1163_v52  ;;  %v979_v52 = vld [vmem:[%s1393_s4] ss:$0 sm:$0xff] }
  0x66   :  { %1061 = vmatpush3.bf16.msra.mxu1 %v1164_v53  ;;  %1040 = vmatprep.subr.bf16.mxu0 %v1165_v54 }
  0x67   :  { %1062 = vmatprep.subr.bf16.mxu1 %v1166_v55 }
  0x69   :  { %1041 = vmatpush3.bf16.msra.mxu0 %v1167_v56 }
  0x6a   :  { %1063 = vmatpush3.bf16.msra.mxu1 %v1168_v57  ;;  %1042 = vmatprep.subr.bf16.mxu0 %v1169_v58 }
  0x6b   :  { %1064 = vmatprep.subr.bf16.mxu1 %v1170_v59 }
  0x6d   :  { %1043 = vmatpush3.bf16.msra.mxu0 %v1171_v60 }
  0x6e   :  { %1065 = vmatpush3.bf16.msra.mxu1 %v1172_v61  ;;  %1044 = vmatprep.subr.bf16.mxu0 %v1173_v62 }
  0x6f   :  { %1066 = vmatprep.subr.bf16.mxu1 %v1174_v63 }
  0x71   :  { %1045 = vmatpush3.bf16.msra.mxu0 %v1175_v0 }
  0x72   :  { %1067 = vmatpush3.bf16.msra.mxu1 %v1176_v1  ;;  %1046 = vmatprep.subr.bf16.mxu0 %v1177_v2 }
  0x73   :  { %1068 = vmatprep.subr.bf16.mxu1 %v1178_v3 }
  0x75   :  { %1047 = vmatpush3.bf16.msra.mxu0 %v1179_v4 }
  0x76   :  { %1069 = vmatpush3.bf16.msra.mxu1 %v1180_v5  ;;  %1085 = vmatprep.subr.bf16.mxu0 %v1296_v13 }
  0x78   :  { %725 = vmatmul.mubr.bf16.vlgmr.msra.gmra.mrb[4].mxu0 %v911_v7 }
  0x79   :  { %765 = vmatmul.mubr.bf16.vlgmr.msra.gmra.mrb[4].mxu1 %v913_v10  ;;  %1086 = vmatpush3.bf16.msra.mxu0 %v1185_v12 }
  0x7a   :  { %1087 = vmatprep.subr.bf16.mxu0 %v1296_v13  ;;  %1101 = vmatprep.mubr.msk.bf16.mxu0 %vm1297_vm0, %v1296_v13 }
  0x7d   :  { %1088 = vmatpush3.bf16.msra.mxu0 %v1186_v14 }
  0x7e   :  { %1089 = vmatprep.subr.bf16.mxu0 %v1296_v13 }
  0x81   :  { %1090 = vmatpush3.bf16.msra.mxu0 %v1187_v15 }
  0x82   :  { %1091 = vmatprep.subr.bf16.mxu0 %v1296_v13 }
  0x85   :  { %1092 = vmatpush3.bf16.msra.mxu0 %v1188_v16 }
  0x86   :  { %1093 = vmatprep.subr.bf16.mxu0 %v1296_v13 }
  0x89   :  { %1094 = vmatpush3.bf16.msra.mxu0 %v1189_v17 }
  0x8a   :  { %1095 = vmatprep.subr.bf16.mxu0 %v1296_v13 }
  0x8d   :  { %1096 = vmatpush3.bf16.msra.mxu0 %v1190_v18 }
  0x8e   :  { %1097 = vmatprep.subr.bf16.mxu0 %v1296_v13 }
  0x91   :  { %1098 = vmatpush3.bf16.msra.mxu0 %v1191_v19 }
  0x92   :  { %1099 = vmatprep.subr.bf16.mxu0 %v1296_v13 }
  0x95   :  { %1100 = vmatpush3.bf16.msra.mxu0 %v1192_v20 }
 0x12b   :  { %v1004_v21 = vpop.f32.mrb[0].mxu0 }
 0x12c   :  { %v1026_v22 = vpop.f32.mrb[0].mxu1  ;;  %v1005_v24 = vpop.f32.mrb[1].mxu0 }
 0x12d   :  { %v1027_v25 = vpop.f32.mrb[1].mxu1  ;;  %v1006_v26 = vadd.f32 %v1005_v24, %v1004_v21  ;;  %v1007_v28 = vpop.f32.mrb[2].mxu0 }
 0x12e   :  { %v1028_v27 = vadd.f32 %v1027_v25, %v1026_v22  ;;  %v1029_v29 = vpop.f32.mrb[2].mxu1  ;;  %v1008_v30 = vpop.f32.mrb[3].mxu0 }
 0x12f   :  { %v1030_v31 = vpop.f32.mrb[3].mxu1  ;;  %v647_v32 = vadd.f32 %v1006_v26, %v906_v23 }
 0x131   :  { %v687_v33 = vadd.f32 %v1028_v27, %v647_v32 }
 0x14b   :  { %v1048_v34 = vpop.f32.mrb[4].mxu0 }
 0x14c   :  { %v1070_v35 = vpop.f32.mrb[4].mxu1  ;;  %v1049_v36 = vpop.f32.mrb[5].mxu0 }
 0x14d   :  { %v1071_v37 = vpop.f32.mrb[5].mxu1  ;;  %v1050_v38 = vadd.f32 %v1049_v36, %v1048_v34  ;;  %v1051_v40 = vpop.f32.mrb[6].mxu0 }
 0x14e   :  { %v1072_v39 = vadd.f32 %v1071_v37, %v1070_v35  ;;  %v1073_v41 = vpop.f32.mrb[6].mxu1  ;;  %v1052_v42 = vpop.f32.mrb[7].mxu0 }
 0x14f   :  { %v1074_v43 = vpop.f32.mrb[7].mxu1  ;;  %v727_v44 = vadd.f32 %v1050_v38, %v687_v33 }
 0x151   :  { %v767_v45 = vadd.f32 %v1072_v39, %v727_v44 }
 0x153   :  { %v772_v46 = vsub.f32 0.0, %v767_v45 }
 0x155   :  { %v773_v47 = vmul.f32 1.442695, %v772_v46 }
 0x157   :  { %1193 = vpow2.f32 %v773_v47 }
 0x161   :  { %v1194_v48 = vpop.eup %1193 }
 0x162   :  { %v775_v49 = vadd.f32 1.0, %v1194_v48 }
 0x164   :  { %1195 = vrcp.f32 %v775_v49 }
 0x16e   :  { %v1196_v50 = vpop.eup %1195 }
 0x16f   :  { %v777_v51 = vpack.c.bf16 %v1196_v50, %v1196_v50 }
 0x171   :  { %1102 = vmatmul.mubr.bf16.vlgmr.msra.gmra.mrb[8].mxu0 %v777_v51 }
 0x244   :  { %v883_v53 = vpop.f32.mrb[8].mxu0 }
 0x245   :  { %v884_v54 = vadd.f32 %v979_v52, %v883_v53  ;;  %v1103_v55 = vpop.f32.mrb[9].mxu0 }
 0x246   :  { %v886_v56 = vpop.f32.mrb[10].mxu0 }
 0x247   :  { %889 = vst [vmem:[#allocation8] sm:$0xff] %v884_v54  ;;  %v1104_v57 = vpop.f32.mrb[11].mxu0 }
 0x248   :  { %1274 = shalt.err (!%p1271_p0)
}
 0x249   :  { %s1275_s4 = scalar_lea.hbm %s1394_s5, 128 }
 0x24a   :  { %p1276_p1 = scmp.ne.s32.totalorder %s1394_s5, %s1275_s4  ;;  %p1279_p2 = scmp.lt.u32.totalorder %s1275_s4, %s1394_s5 }
 0x24c   :  { %p1281_p3 = pnand %p1279_p2, %p1276_p1 }
 0x24e   :  { %1284 = shalt.err (!%p1281_p3)
}
 0x24f   :  { %899 = dma.vmem_to_hbm [thread:$0]  %s897_s7, 128, %s1394_s5, [#allocation4]  }
 0x250   :  { %1289 = dma.done.wait [#allocation4], 128  }
 0x251   :  { %1290 = vsyncadd [#allocation4], 4294967168 }
 0x252   :  { %903 = vsyncpa [#allocation3], 1 }
 0x253   :  { %904 = vsyncpa [#allocation6], 1 }
 0x254   :  { %905 = vsyncpa [#allocation4], 1 }

</bundles_post_ra>
